<compile_context>
chip_gen: v7x
topology: tpu7x:2x2x1
jax: 0.10.0
libtpu: 0.0.40
codegen_flags: <defaults>
</compile_context>

<pallas_src>
import jax
import jax.numpy as jnp
from jax.experimental import pallas as pl
from jax.experimental.pallas import tpu as pltpu

_LANES = 128
_TARGET_BLOCK_BYTES = 4 << 20   # ~4 MiB/block: >=85% of HBM roofline, fits all gens
_MIN_SPLIT_BYTES = 1 << 20      # below this, per-step overhead dominates: one block


def _relu_kernel(x_ref, o_ref):
    # Elementwise max(x, 0) on the whole VMEM tile (pure VPU; DMA/HBM
    # bandwidth is the binding unit, never the VALU).
    o_ref[...] = jnp.maximum(x_ref[...], jnp.zeros((), x_ref.dtype))


def _round_up(a: int, m: int) -> int:
    return ((a + m - 1) // m) * m


def _choose_tile_rows(rows: int, itemsize: int) -> int:
    """Block height: ~4 MiB blocks; >=4 near-equal blocks (even count) when >1 MiB."""
    sublane = max(8, 32 // itemsize)          # 8 f32 / 16 bf16 / 32 int8,fp8
    row_bytes = _LANES * itemsize
    total_bytes = rows * row_bytes

    if total_bytes <= _MIN_SPLIT_BYTES or rows <= 4 * sublane:
        # Tiny array: a single block spanning the full row extent (block equal
        # to the full dim is always legal; splitting would just add per-step
        # pipeline overhead).
        return rows

    target_rows = max(sublane, (_TARGET_BLOCK_BYTES // row_bytes) // sublane * sublane)
    # At least 4 blocks so in/out DMA of neighbouring blocks overlap, and an
    # even count so v7x's 2-TC grid sharding stays balanced.
    n_blocks = max(4, pl.cdiv(rows, target_rows))
    n_blocks = _round_up(n_blocks, 2)
    # Near-equal blocks, rounded to the sublane packing multiple so the last
    # (possibly ragged) block still stores with unmasked vst.
    return _round_up(pl.cdiv(rows, n_blocks), sublane)


def _relu_rows(x2d: jax.Array, donate_input: bool) -> jax.Array:
    rows = x2d.shape[0]
    itemsize = jnp.dtype(x2d.dtype).itemsize
    tile_rows = _choose_tile_rows(rows, itemsize)
    grid = (pl.cdiv(rows, tile_rows),)

    return pl.pallas_call(
        _relu_kernel,
        out_shape=jax.ShapeDtypeStruct((rows, _LANES), x2d.dtype),
        grid_spec=pltpu.PrefetchScalarGridSpec(
            num_scalar_prefetch=0,
            grid=grid,
            in_specs=[pl.BlockSpec((tile_rows, _LANES), lambda i: (i, 0))],
            out_specs=pl.BlockSpec((tile_rows, _LANES), lambda i: (i, 0)),
        ),
        compiler_params=pltpu.CompilerParams(
            dimension_semantics=("parallel",),
            # in + out blocks, each double-buffered: ~4x block bytes of scoped
            # VMEM (<=16 MiB at 4 MiB blocks).  32 MiB stays within v7x's
            # 64 MiB physical VMEM and above v5e's 16 MiB scoped default.
            vmem_limit_bytes=32 * 1024 * 1024,
        ),
        cost_estimate=pl.CostEstimate(
            flops=rows * _LANES,
            transcendentals=0,
            bytes_accessed=2 * rows * _LANES * itemsize,
        ),
        # In-place update is safe (each grid step reads block i before writing
        # block i).  Only enabled on request: it is a win when the caller
        # donates the input / it is a temporary inside jit; otherwise XLA
        # inserts a defensive copy (an extra HBM pass).
        input_output_aliases={0: 0} if donate_input else {},
    )(x2d)


def relu_pallas(x: jax.Array, *, donate_input: bool = False) -> jax.Array:
    """Applies ReLU elementwise, preserving shape and dtype."""
    orig_shape = x.shape
    n = x.size

    # Zero-size or sub-lane-width inputs: not worth a kernel launch (and
    # rows == 0 would produce an empty grid at trace time).
    if n < _LANES:
        return jnp.maximum(x, jnp.zeros((), x.dtype))

    x_flat = jnp.ravel(x)
    n_main = (n // _LANES) * _LANES
    rows = n_main // _LANES

    if n_main == n:
        # Typical case (conv/MLP activations): flat size is lane-aligned, the
        # reshape of a contiguous array is free, no extra HBM passes.
        out2d = _relu_rows(x_flat.reshape(rows, _LANES), donate_input)
        return out2d.reshape(orig_shape)

    # Ragged size: kernel over the 128-aligned prefix, plain jnp.maximum for
    # the <128-element tail (avoids full-array pad + slice HBM passes).
    out_main = _relu_rows(x_flat[:n_main].reshape(rows, _LANES), donate_input)
    tail_out = jnp.maximum(x_flat[n_main:], jnp.zeros((), x.dtype))
    return jnp.concatenate([out_main.reshape(-1), tail_out]).reshape(orig_shape)


if __name__ == "__main__":
    key = jax.random.PRNGKey(0)
    # Small NCHW input consistent with the PyTorch module's forward.
    x = jax.random.normal(key, (2, 4, 16, 16), dtype=jnp.float32)

    y = relu_pallas(x)
    jax.block_until_ready(y)
    y_ref = jnp.maximum(x, 0.0)
    assert y.shape == x.shape and y.dtype == x.dtype
    assert bool(jnp.all(y == y_ref))

    # Exercise the multi-block (>1 MiB -> >=4 even blocks, DMA overlap) path.
    x_big = jax.random.normal(jax.random.PRNGKey(1), (8, 16, 64, 64), dtype=jnp.float32)
    y_big = relu_pallas(x_big)
    jax.block_until_ready(y_big)
    assert bool(jnp.all(y_big == jnp.maximum(x_big, 0.0)))

    # Exercise the ragged (n % 128 != 0) prefix + tail path.
    x_rag = jax.random.normal(jax.random.PRNGKey(2), (1, 1000), dtype=jnp.float32)
    y_rag = relu_pallas(x_rag)
    jax.block_until_ready(y_rag)
    assert bool(jnp.all(y_rag == jnp.maximum(x_rag, 0.0)))

    print("KERNEL_OK")
</pallas_src>

<mosaic_0001>
module attributes {stable_mosaic.version = 11 : i64} {
  func.func @_relu_kernel(%arg0: i32, %arg1: memref<16x128xf32, #tpu.memory_space<vmem>>, %arg2: memref<16x128xf32, #tpu.memory_space<vmem>>) attributes {dimension_semantics = [#tpu.dimension_semantics<parallel>], iteration_bounds = array<i64: 1>, scalar_prefetch = 0 : i64, scratch_operands = 0 : i64, tpu.core_type = #tpu.core_type<tc>, window_params = [{transform_indices = @transform_0, window_bounds = array<i64: 16, 128>}, {transform_indices = @transform_1, window_bounds = array<i64: 16, 128>}]} {
    %c0 = arith.constant 0 : index
    %c0_0 = arith.constant 0 : index
    %0 = vector.load %arg1[%c0, %c0_0] : memref<16x128xf32, #tpu.memory_space<vmem>>, vector<16x128xf32>
    %cst = arith.constant 0.000000e+00 : f32
    %1 = vector.broadcast %cst : f32 to vector<16x128xf32>
    %2 = arith.maximumf %0, %1 : vector<16x128xf32>
    %c0_1 = arith.constant 0 : index
    %c0_2 = arith.constant 0 : index
    %3 = vector.load %arg2[%c0_1, %c0_2] : memref<16x128xf32, #tpu.memory_space<vmem>>, vector<16x128xf32>
    tpu.vector_store %arg2[%c0_1, %c0_2], %2 {strides = array<i32>} : memref<16x128xf32, #tpu.memory_space<vmem>>, vector<16x128xf32>,
    return
  }
  func.func @transform_0(%arg0: i32) -> (i32, i32) {
    %c0_i32 = arith.constant 0 : i32
    %c0_i32_0 = arith.constant 0 : i32
    return %arg0, %c0_i32 : i32, i32
  }
  func.func @transform_1(%arg0: i32) -> (i32, i32) {
    %c0_i32 = arith.constant 0 : i32
    %c0_i32_0 = arith.constant 0 : i32
    return %arg0, %c0_i32 : i32, i32
  }
}

</mosaic_0001>

<bundles_post_ra>
// kernel: tpu_custom_call.1
= control target key start
LH: loop header
LB: loop body
LE: loop exit
PB: predicated region body
PF: predicated region fallthrough
CT: control target
= control target key end

     0   :  { %6 = vsyncpa [#allocation3], 0  ;;  %s136_s0 = inlined_call_operand.hbm [shape: f32[16,128], index: 0, kind: input, shape index: {}]   ;;  %s137_s1 = inlined_call_operand.hbm [shape: f32[16,128], index: 1, kind: output, shape index: {}]  }
   0x1   :  { %7 = vsyncpa [#allocation4], 0  ;;  %s98_s6 = smov [#allocation2]   ;;  %s50_s10 = scalar_lea.hbm %s136_s0, 256 }
   0x2   :  { %s13_s7 = sshll.u32 %s98_s6, 4  ;;  %p51_p0 = scmp.ne.s32.totalorder %s136_s0, %s50_s10  ;;  %s14_s7 = int_to_ptr.vmem [resolvable:$true] %s13_s7 }
   0x3   :  { %p54_p1 = scmp.lt.u32.totalorder %s50_s10, %s136_s0 }
   0x5   :  { %p56_p2 = pnand %p54_p1, %p51_p0 }
   0x7   :  { %59 = shalt.err (!%p56_p2)
}
   0x8   :  { %s60_s15 = scalar_lea.vmem %s14_s7, 256  ;;  %p65_p4 = scmp.lt.s32.totalorder %s14_s7, %s14_s7 }
   0x9   :  { %p61_p3 = scmp.ne.s32.totalorder %s14_s7, %s60_s15  ;;  %p66_p5 = scmp.lt.s32.totalorder %s60_s15, %s60_s15 }
   0xb   :  { %p67_p6 = por %p66_p5, %p65_p4 }
   0xd   :  { %p68_p7 = pnand %p67_p6, %p61_p3 }
   0xf   :  { %71 = shalt.err (!%p68_p7)
}
  0x10   :  { %s99_s16 = smov 128   ;;  %s100_s17 = smov 8  }
  0x11   :  { %19 = dma.hbm_to_vmem [thread:$0]  %s136_s0, 256, %s14_s7, [#allocation3], %s99_s16, %s99_s16, %s100_s17  }
  0x12   :  { %94 = dma.done.wait [#allocation3], 256  }
  0x13   :  { %95 = vsyncadd [#allocation3], 4294967040  ;;  %s101_s20 = smov [#allocation5]   ;;  %v23_v0 = vld [vmem:[#allocation2] sm:$0xff]  ;;  %v24_v1 = vld [vmem:[#allocation2 + $0x8] sm:$0xff] }
  0x14   :  { %s34_s21 = sshll.u32 %s101_s20, 4  ;;  %v25_v2 = vmax.f32 %v23_v0, 0.0  ;;  %v26_v3 = vmax.f32 %v24_v1, 0.0  ;;  %s35_s21 = int_to_ptr.vmem [resolvable:$true] %s34_s21 }
  0x15   :  { %s72_s22 = scalar_lea.vmem %s35_s21, 256  ;;  %p77_p9 = scmp.lt.s32.totalorder %s35_s21, %s35_s21 }
  0x16   :  { %27 = vst [vmem:[#allocation5] sm:$0xff] %v25_v2  ;;  %28 = vst [vmem:[#allocation5 + $0x8] sm:$0xff] %v26_v3  ;;  %p73_p8 = scmp.ne.s32.totalorder %s35_s21, %s72_s22  ;;  %p78_p10 = scmp.lt.s32.totalorder %s72_s22, %s72_s22 }
  0x18   :  { %p79_p11 = por %p78_p10, %p77_p9 }
  0x1a   :  { %p80_p12 = pnand %p79_p11, %p73_p8 }
  0x1c   :  { %83 = shalt.err (!%p80_p12)
}
  0x1d   :  { %s84_s24 = scalar_lea.hbm %s137_s1, 256 }
  0x1e   :  { %p85_p13 = scmp.ne.s32.totalorder %s137_s1, %s84_s24  ;;  %p88_p0 = scmp.lt.u32.totalorder %s84_s24, %s137_s1 }
  0x20   :  { %p90_p1 = pnand %p88_p0, %p85_p13 }
  0x22   :  { %93 = shalt.err (!%p90_p1)
}
  0x23   :  { %40 = dma.vmem_to_hbm [thread:$0]  %s35_s21, 256, %s137_s1, [#allocation4], %s99_s16, %s99_s16, %s100_s17  }
  0x24   :  { %96 = dma.done.wait [#allocation4], 256  }
  0x25   :  { %97 = vsyncadd [#allocation4], 4294967040 }
  0x26   :  { %44 = vsyncpa [#allocation3], 1 }
  0x27   :  { %45 = vsyncpa [#allocation4], 1 }

</bundles_post_ra>
